<compile_context>
chip_gen: v7x
topology: tpu7x:2x2x1
jax: 0.10.0
libtpu: 0.0.40
codegen_flags: <defaults>
</compile_context>

<pallas_src>
import jax
import jax.numpy as jnp
from jax import lax
from jax.experimental import pallas as pl
from jax.experimental.pallas import tpu as pltpu


# ----------------------------------------------------------------------------
# Graph preprocessing (plain JAX glue; matches Comp_degree + Laplacian norm)
# ----------------------------------------------------------------------------
def comp_degree(A):
    """Degree matrix of a graph (matches Comp_degree in the PyTorch code)."""
    out_degree = jnp.sum(A, axis=0)
    in_degree = jnp.sum(A, axis=1)
    eye = jnp.eye(A.shape[0], dtype=A.dtype)
    return eye * in_degree + eye * out_degree - jnp.diag(jnp.diagonal(A))


def laplacian_eigvecs(A):
    """Eigenvector matrix U of the normalized Laplacian of A (n, n)."""
    deg_mat = comp_degree(A)
    deg_diag = jnp.diagonal(deg_mat)
    inv_sqrt = jnp.where(deg_diag > 0.0, deg_diag ** -0.5, 0.0)
    frac_degree = jnp.diag(inv_sqrt)
    lap_norm = frac_degree @ ((deg_mat - A) @ frac_degree)
    # TODO(synk): torch.eig (general, unsorted) has no Pallas/TPU equivalent;
    #             jnp.linalg.eigh (symmetric Laplacian) runs in plain JAX.
    _, U = jnp.linalg.eigh(lap_norm)
    return U


# ----------------------------------------------------------------------------
# Small helpers
# ----------------------------------------------------------------------------
_HEADROOM = 4 << 20  # bytes left for semaphores / compiler-internal scratch


def _round_up(x, m):
    return (x + m - 1) // m * m


def _vmem_budget():
    """~85% of this generation's per-core VMEM (v5e/v6e ~109 MiB, v7x ~54 MiB)."""
    cap = 64 << 20
    try:
        info = pltpu.get_tpu_info()
        c = getattr(info, "vmem_capacity_bytes", None)
        if c:
            cap = int(c)
    except Exception:
        pass
    return int(cap * 0.85)


def _pick_tile(dim, unit, fits, prefer_split_min=None):
    """Largest multiple-of-`unit` divisor of `dim` passing `fits`.

    If `prefer_split_min` is set, prefer the largest tile that still yields
    >= 2 grid steps while being >= prefer_split_min rows (keeps both v7x
    TensorCores busy without under-filling the MXU); otherwise just take the
    largest fitting tile (best for single-TC v5e/v6e).  The full dim is always
    a legal block (BlockSpec rule: divisible by (8,128) OR equal to the dim).
    """
    cands = [t for t in range(unit, dim, unit) if dim % t == 0]
    cands.append(dim)
    fitting = [t for t in cands if fits(t)]
    if not fitting:
        return cands[0]          # smallest legal tile; footprint is then minimal
    if prefer_split_min is not None:
        split = [t for t in fitting if dim // t >= 2 and t >= prefer_split_min]
        if split:
            return max(split)
    return max(fitting)


def _pad_mlp_params(w1, b1, w2, b2, compute_dtype):
    """Zero-pad hidden/out dims to multiples of 128 so stores are lane-dense."""
    d, hid = w1.shape
    out_dim = w2.shape[1]
    hp = _round_up(hid, 128)
    op = _round_up(out_dim, 128)
    w1p = jnp.zeros((d, hp), jnp.float32).at[:, :hid].set(w1).astype(compute_dtype)
    b1p = jnp.zeros((1, hp), jnp.float32).at[0, :hid].set(b1)
    w2p = jnp.zeros((hp, op), jnp.float32).at[:hid, :out_dim].set(w2).astype(compute_dtype)
    b2p = jnp.zeros((1, op), jnp.float32).at[0, :out_dim].set(b2)
    return w1p, b1p, w2p, b2p, hp, op


def _fused_shared_fits(n, d, hp, op, esz, budget):
    """Conservative VMEM footprint check for the fully-fused shared-A kernel."""
    u_res = 2 * (2 * n * n * esz)                       # U + Ut (count double-buffered)
    weights = (d * hp + hp * op) * esz + (hp + op) * 4
    stream = 2 * n * d * esz + 2 * n * op * 4           # x / out blocks, double-buffered
    interm = n * (d + hp + op) * 4 + n * max(hp, op) * esz
    return u_res + weights + stream + interm + _HEADROOM <= budget


# ----------------------------------------------------------------------------
# Pallas kernels
# ----------------------------------------------------------------------------
def _gconv_shared_fused_kernel(ut_ref, u_ref, x_ref, w1_ref, b1_ref, w2_ref,
                               b2_ref, o_ref):
    """Whole forward for one graph of the batch: U^T @ x -> MLP -> U @ (.)."""
    x = x_ref[0]                                                      # (n, d)
    agg = jnp.dot(ut_ref[...], x, preferred_element_type=jnp.float32)  # U^T @ x
    h = jnp.dot(agg.astype(w1_ref.dtype), w1_ref[...],
                preferred_element_type=jnp.float32)
    h = jnp.maximum(h + b1_ref[...], 0.0)
    m = jnp.dot(h.astype(w2_ref.dtype), w2_ref[...],
                preferred_element_type=jnp.float32) + b2_ref[...]
    o_ref[0] = jnp.dot(u_ref[...], m.astype(u_ref.dtype),
                       preferred_element_type=jnp.float32).astype(o_ref.dtype)


def _tiled_matmul_kernel(a_ref, b_ref, o_ref, acc_ref):
    """Row-tile x K-tile step of A @ B with an f32 VMEM accumulator (P3)."""
    @pl.when(pl.program_id(1) == 0)
    def _():
        acc_ref[...] = jnp.zeros_like(acc_ref)

    acc_ref[...] += jnp.dot(a_ref[...], b_ref[...],
                            preferred_element_type=jnp.float32)

    @pl.when(pl.program_id(1) == pl.num_programs(1) - 1)
    def _():
        o_ref[...] = acc_ref[...].astype(o_ref.dtype)


def _mlp_kernel(x_ref, w1_ref, b1_ref, w2_ref, b2_ref, o_ref):
    """Row-tile of Linear -> ReLU -> Linear (BatchNorm1d in eval == identity)."""
    h = jnp.dot(x_ref[...], w1_ref[...], preferred_element_type=jnp.float32)
    h = jnp.maximum(h + b1_ref[...], 0.0)
    o = jnp.dot(h.astype(w2_ref.dtype), w2_ref[...],
                preferred_element_type=jnp.float32) + b2_ref[...]
    o_ref[...] = o.astype(o_ref.dtype)


def _gconv_batched_kernel(u_ref, x_ref, w1_ref, b1_ref, w2_ref, b2_ref, o_ref):
    """Fused per-graph path (batched adjacency): U^T @ x -> MLP -> U @ (.)."""
    u = u_ref[0]                       # (n, n): changes every step, so a wrapper
    x = x_ref[0]                       # transpose would not amortize and would
    # double U's HBM traffic; any relayout hides under the 4 chained matmuls.
    agg = lax.dot_general(u, x, dimension_numbers=(((0,), (0,)), ((), ())),
                          preferred_element_type=jnp.float32)        # U^T @ x
    h = jnp.dot(agg.astype(w1_ref.dtype), w1_ref[...],
                preferred_element_type=jnp.float32)
    h = jnp.maximum(h + b1_ref[...], 0.0)
    m = jnp.dot(h.astype(w2_ref.dtype), w2_ref[...],
                preferred_element_type=jnp.float32) + b2_ref[...]
    o_ref[0] = jnp.dot(u, m.astype(u.dtype),
                       preferred_element_type=jnp.float32).astype(o_ref.dtype)


# ----------------------------------------------------------------------------
# Wrappers
# ----------------------------------------------------------------------------
def _graph_conv_shared_fused(features, U, Ut, w1, b1, w2, b2, compute_dtype, budget):
    """Single fused kernel: grid over batch, U/U^T/weights VMEM-resident."""
    b, n, d = features.shape
    out_dim = w2.shape[1]
    w1p, b1p, w2p, b2p, hp, op = _pad_mlp_params(w1, b1, w2, b2, compute_dtype)
    esz = jnp.dtype(compute_dtype).itemsize

    ut_c = Ut.astype(compute_dtype)
    u_c = U.astype(compute_dtype)
    x_c = features.astype(compute_dtype)      # no (1,0,2) transpose needed

    out = pl.pallas_call(
        _gconv_shared_fused_kernel,
        out_shape=jax.ShapeDtypeStruct((b, n, op), jnp.float32),
        grid_spec=pltpu.PrefetchScalarGridSpec(
            num_scalar_prefetch=0,
            grid=(b,),
            in_specs=[
                pl.BlockSpec((n, n), lambda i: (0, 0)),        # U^T, resident
                pl.BlockSpec((n, n), lambda i: (0, 0)),        # U,   resident
                pl.BlockSpec((1, n, d), lambda i: (i, 0, 0)),  # x_i
                pl.BlockSpec((d, hp), lambda i: (0, 0)),       # W1
                pl.BlockSpec((1, hp), lambda i: (0, 0)),       # b1
                pl.BlockSpec((hp, op), lambda i: (0, 0)),      # W2
                pl.BlockSpec((1, op), lambda i: (0, 0)),       # b2
            ],
            out_specs=pl.BlockSpec((1, n, op), lambda i: (i, 0, 0)),
        ),
        compiler_params=pltpu.CompilerParams(
            dimension_semantics=("parallel",),        # batch >= 2 feeds both v7x TCs
            vmem_limit_bytes=budget),
        cost_estimate=pl.CostEstimate(
            flops=2 * b * (n * n * d + n * d * hp + n * hp * op + n * n * op),
            transcendentals=0,
            bytes_accessed=(2 * n * n + d * hp + hp * op) * esz
                           + b * n * d * esz + b * n * op * 4 + (hp + op) * 4),
    )(ut_c, u_c, x_c, w1p, b1p, w2p, b2p)
    return out[..., :out_dim]


def _tiled_matmul(a, b_mat, out_dtype, budget):
    """A (R,K) @ B (K,C) with row tiling + K-axis accumulator, VMEM-bounded."""
    R, K = a.shape
    _, C = b_mat.shape
    esz = jnp.dtype(a.dtype).itemsize
    osz = jnp.dtype(out_dtype).itemsize

    def k_fits(tk):
        m_guess = min(R, 256)
        return (2 * tk * C * esz + 2 * m_guess * tk * esz
                + 2 * m_guess * C * osz + m_guess * C * 4 + _HEADROOM) <= budget

    tk = _pick_tile(K, 128, k_fits)            # largest fitting K panel

    def r_fits(tr):
        return (2 * tr * tk * esz + 2 * tk * C * esz
                + 2 * tr * C * osz + tr * C * 4 + _HEADROOM) <= budget

    tr = _pick_tile(R, 8, r_fits, prefer_split_min=256)
    # TODO(synk): a column (C) grid axis would be needed if b*d / b*op columns
    #             alone ever exceed the VMEM budget; not tiled here.

    return pl.pallas_call(
        _tiled_matmul_kernel,
        out_shape=jax.ShapeDtypeStruct((R, C), out_dtype),
        grid_spec=pltpu.PrefetchScalarGridSpec(
            num_scalar_prefetch=0,
            grid=(R // tr, K // tk),
            in_specs=[
                pl.BlockSpec((tr, tk), lambda i, k: (i, k)),
                pl.BlockSpec((tk, C), lambda i, k: (k, 0)),
            ],
            out_specs=pl.BlockSpec((tr, C), lambda i, k: (i, 0)),
            scratch_shapes=[pltpu.VMEM((tr, C), jnp.float32)],
        ),
        compiler_params=pltpu.CompilerParams(
            dimension_semantics=("parallel", "arbitrary"),
            vmem_limit_bytes=budget),
        cost_estimate=pl.CostEstimate(
            flops=2 * R * K * C, transcendentals=0,
            bytes_accessed=(R * K + K * C) * esz + R * C * osz),
    )(a, b_mat)


def _graph_conv_shared_tiled(features, U, Ut, w1, b1, w2, b2, compute_dtype, budget):
    """Large-working-set fallback: three tiled passes (intermediates in HBM)."""
    b, n, d = features.shape
    out_dim = w2.shape[1]
    w1p, b1p, w2p, b2p, hp, op = _pad_mlp_params(w1, b1, w2, b2, compute_dtype)
    esz = jnp.dtype(compute_dtype).itemsize

    ut_c = Ut.astype(compute_dtype)
    u_c = U.astype(compute_dtype)
    # TODO(synk): this (1,0,2) transpose is an XLA HBM copy; only the fallback
    #             pays it (the fused path reads (b,n,d) blocks directly).
    x2 = jnp.transpose(features, (1, 0, 2)).reshape(n, b * d).astype(compute_dtype)

    # -- pass 1:  AGG = U^T @ X  as one (n,n) @ (n,b*d) matmul, K-tiled --------
    agg = _tiled_matmul(ut_c, x2, compute_dtype, budget)

    # -- pass 2:  MLP over all (node, batch) rows -------------------------------
    rows = n * b
    agg_rows = agg.reshape(rows, d)                    # free row-major relabel

    def mlp_fits(t):
        need = (d * hp + hp * op) * esz + (hp + op) * 4
        need += 2 * t * d * esz + 2 * t * op * esz
        return need + _HEADROOM <= budget

    tr = _pick_tile(rows, 8, mlp_fits, prefer_split_min=256)
    mlp = pl.pallas_call(
        _mlp_kernel,
        out_shape=jax.ShapeDtypeStruct((rows, op), compute_dtype),
        grid_spec=pltpu.PrefetchScalarGridSpec(
            num_scalar_prefetch=0,
            grid=(rows // tr,),
            in_specs=[
                pl.BlockSpec((tr, d), lambda i: (i, 0)),
                pl.BlockSpec((d, hp), lambda i: (0, 0)),        # W1
                pl.BlockSpec((1, hp), lambda i: (0, 0)),        # b1
                pl.BlockSpec((hp, op), lambda i: (0, 0)),       # W2
                pl.BlockSpec((1, op), lambda i: (0, 0)),        # b2
            ],
            out_specs=pl.BlockSpec((tr, op), lambda i: (i, 0)),
        ),
        compiler_params=pltpu.CompilerParams(
            dimension_semantics=("parallel",),
            vmem_limit_bytes=budget),
        cost_estimate=pl.CostEstimate(
            flops=2 * rows * (d * hp + hp * op), transcendentals=0,
            bytes_accessed=(rows * d + d * hp + hp * op + rows * op) * esz),
    )(agg_rows, w1p, b1p, w2p, b2p)

    # -- pass 3:  OUT = U @ M  as one (n,n) @ (n,b*Op) matmul, K-tiled ----------
    m2 = mlp.reshape(n, b * op)                        # free row-major relabel
    out2 = _tiled_matmul(u_c, m2, jnp.float32, budget)

    out = out2.reshape(n, b, op).transpose(1, 0, 2)    # (b, n, Op)
    return out[..., :out_dim]


def _graph_conv_batched_A(features, U_b, w1, b1, w2, b2, compute_dtype, budget):
    b, n, d = features.shape
    out_dim = w2.shape[1]
    w1p, b1p, w2p, b2p, hp, op = _pad_mlp_params(w1, b1, w2, b2, compute_dtype)
    esz = jnp.dtype(compute_dtype).itemsize

    base = (2 * n * d * esz + 2 * n * op * 4
            + (d * hp + hp * op) * esz + (hp + op) * 4
            + n * (d + hp + op) * 4 + _HEADROOM)
    if base + 2 * n * n * esz <= budget:
        u_spec = pl.BlockSpec((1, n, n), lambda i: (i, 0, 0))
    else:
        # Single-buffer the per-graph U block to halve its VMEM footprint
        # (its DMA hides behind the four chained matmuls of the previous step).
        u_spec = pl.BlockSpec((1, n, n), lambda i: (i, 0, 0),
                              pipeline_mode=pl.Buffered(1))

    out = pl.pallas_call(
        _gconv_batched_kernel,
        out_shape=jax.ShapeDtypeStruct((b, n, op), jnp.float32),
        grid_spec=pltpu.PrefetchScalarGridSpec(
            num_scalar_prefetch=0,
            grid=(b,),
            in_specs=[
                u_spec,                                         # U_i
                pl.BlockSpec((1, n, d), lambda i: (i, 0, 0)),   # x_i
                pl.BlockSpec((d, hp), lambda i: (0, 0)),
                pl.BlockSpec((1, hp), lambda i: (0, 0)),
                pl.BlockSpec((hp, op), lambda i: (0, 0)),
                pl.BlockSpec((1, op), lambda i: (0, 0)),
            ],
            out_specs=pl.BlockSpec((1, n, op), lambda i: (i, 0, 0)),
        ),
        compiler_params=pltpu.CompilerParams(
            dimension_semantics=("parallel",),
            vmem_limit_bytes=budget),
        cost_estimate=pl.CostEstimate(
            flops=2 * b * (n * n * d + n * d * hp + n * hp * op + n * n * op),
            transcendentals=0,
            bytes_accessed=b * (n * n + n * d) * esz + b * n * op * 4
                           + (d * hp + hp * op) * esz),
    )(U_b.astype(compute_dtype), features.astype(compute_dtype),
      w1p, b1p, w2p, b2p)
    return out[..., :out_dim]


def graph_conv_ortega(features, A, w1, b1, w2, b2, *,
                      compute_dtype=jnp.bfloat16, force_shared_path=None):
    """features: (b, n, d) f32;  A: (n, n) shared or (b, n, n) per-graph.

    w1: (d, hidden), b1: (hidden,), w2: (hidden, out_dim), b2: (out_dim,)
    (PyTorch Linear weights stored transposed so the kernels compute x @ W + b.)
    Returns (b, n, out_dim) f32.  compute_dtype=jnp.bfloat16 feeds the MXU with
    bf16 operands and f32 accumulation (spectral round-trip error grows roughly
    with sqrt(n)); pass jnp.float32 for full precision matching PyTorch.
    """
    features = features.astype(jnp.float32)
    budget = _vmem_budget()
    esz = jnp.dtype(compute_dtype).itemsize

    if A.ndim == 2:
        U = laplacian_eigvecs(A.astype(jnp.float32))
        Ut = U.T                               # one HBM transpose, amortized
        b, n, d = features.shape
        hp = _round_up(w1.shape[1], 128)
        op = _round_up(w2.shape[1], 128)
        use_fused = _fused_shared_fits(n, d, hp, op, esz, budget)
        if force_shared_path == "fused":
            use_fused = True
        elif force_shared_path == "tiled":
            use_fused = False
        if use_fused:
            return _graph_conv_shared_fused(features, U, Ut, w1, b1, w2, b2,
                                            compute_dtype, budget)
        return _graph_conv_shared_tiled(features, U, Ut, w1, b1, w2, b2,
                                        compute_dtype, budget)

    # TODO(synk): per-graph eigendecompositions run in plain JAX (vmap eigh) and
    #             typically dominate end-to-end time for this path.
    U_b = jax.vmap(laplacian_eigvecs)(A.astype(jnp.float32))
    return _graph_conv_batched_A(features, U_b, w1, b1, w2, b2,
                                 compute_dtype, budget)


# ----------------------------------------------------------------------------
# Deterministic parameter init (xavier_uniform weights, zero biases)
# ----------------------------------------------------------------------------
def xavier_uniform(key, fan_in, fan_out):
    limit = jnp.sqrt(6.0 / (fan_in + fan_out))
    return jax.random.uniform(key, (fan_in, fan_out), jnp.float32, -limit, limit)


if __name__ == "__main__":
    key = jax.random.PRNGKey(0)
    k_feat, k_adj, k_w1, k_w2, k_adj_b = jax.random.split(key, 5)

    # Small shapes consistent with the module (hidden_dim default = 128).
    B, N, IN_DIM, HIDDEN, OUT_DIM = 2, 128, 32, 128, 64

    features = jax.random.normal(k_feat, (B, N, IN_DIM), jnp.float32)

    # Symmetric shared adjacency with self-loops, non-negative weights.
    raw = jax.random.uniform(k_adj, (N, N), jnp.float32)
    A = 0.5 * (raw + raw.T) + jnp.eye(N, dtype=jnp.float32)

    # MLP(num_layers=2, in_dim, hidden_dim=128, out_dim) parameters.
    w1 = xavier_uniform(k_w1, IN_DIM, HIDDEN)
    b1 = jnp.zeros((HIDDEN,), jnp.float32)
    w2 = xavier_uniform(k_w2, HIDDEN, OUT_DIM)
    b2 = jnp.zeros((OUT_DIM,), jnp.float32)

    def rel_err(x, y):
        return float(jnp.max(jnp.abs(x - y)) / (jnp.max(jnp.abs(y)) + 1e-6))

    # Plain-JAX reference (shared A).
    U = laplacian_eigvecs(A)
    agg = jnp.einsum("nm,bnd->bmd", U, features)                  # U^T @ x
    mo = jnp.maximum(agg @ w1 + b1, 0.0) @ w2 + b2
    ref = jnp.einsum("nm,bmo->bno", U, mo)                        # U @ mlp

    # Shared-A path (fully fused single kernel at these sizes).
    out = jax.block_until_ready(graph_conv_ortega(features, A, w1, b1, w2, b2))
    assert out.shape == (B, N, OUT_DIM)
    assert bool(jnp.all(jnp.isfinite(out)))
    assert rel_err(out, ref) < 5e-2, f"fused path error too large: {rel_err(out, ref)}"

    # Large-working-set fallback (three tiled passes) — forced for a cross-check.
    out_t = jax.block_until_ready(
        graph_conv_ortega(features, A, w1, b1, w2, b2, force_shared_path="tiled"))
    assert out_t.shape == (B, N, OUT_DIM)
    assert bool(jnp.all(jnp.isfinite(out_t)))
    assert rel_err(out_t, ref) < 5e-2, f"tiled path error too large: {rel_err(out_t, ref)}"

    # Batched-adjacency path (per-graph eigenvectors).
    rawb = jax.random.uniform(k_adj_b, (B, N, N), jnp.float32)
    Ab = 0.5 * (rawb + jnp.swapaxes(rawb, 1, 2)) + jnp.eye(N, dtype=jnp.float32)
    outb = jax.block_until_ready(graph_conv_ortega(features, Ab, w1, b1, w2, b2))
    assert outb.shape == (B, N, OUT_DIM)
    assert bool(jnp.all(jnp.isfinite(outb)))
    U_b = jax.vmap(laplacian_eigvecs)(Ab)
    aggb = jnp.einsum("bnm,bnd->bmd", U_b, features)
    mob = jnp.maximum(aggb @ w1 + b1, 0.0) @ w2 + b2
    refb = jnp.einsum("bnm,bmo->bno", U_b, mob)
    assert rel_err(outb, refb) < 5e-2, f"batched path error too large: {rel_err(outb, refb)}"

    print("KERNEL_OK")
</pallas_src>

<mosaic_0001>
module attributes {stable_mosaic.version = 11 : i64} {
  func.func @_gconv_shared_fused_kernel(%arg0: i32, %arg1: memref<128x128xbf16, #tpu.memory_space<vmem>>, %arg2: memref<128x128xbf16, #tpu.memory_space<vmem>>, %arg3: memref<1x128x32xbf16, #tpu.memory_space<vmem>>, %arg4: memref<32x128xbf16, #tpu.memory_space<vmem>>, %arg5: memref<1x128xf32, #tpu.memory_space<vmem>>, %arg6: memref<128x128xbf16, #tpu.memory_space<vmem>>, %arg7: memref<1x128xf32, #tpu.memory_space<vmem>>, %arg8: memref<1x128x128xf32, #tpu.memory_space<vmem>>) attributes {dimension_semantics = [#tpu.dimension_semantics<parallel>], iteration_bounds = array<i64: 2>, scalar_prefetch = 0 : i64, scratch_operands = 0 : i64, tpu.core_type = #tpu.core_type<tc>, window_params = [{pipeline_mode = #tpu.pipeline_mode<synchronous>, transform_indices = @transform_0, window_bounds = array<i64: 128, 128>}, {pipeline_mode = #tpu.pipeline_mode<synchronous>, transform_indices = @transform_1, window_bounds = array<i64: 128, 128>}, {transform_indices = @transform_2, window_bounds = array<i64: 1, 128, 32>}, {pipeline_mode = #tpu.pipeline_mode<synchronous>, transform_indices = @transform_3, window_bounds = array<i64: 32, 128>}, {pipeline_mode = #tpu.pipeline_mode<synchronous>, transform_indices = @transform_4, window_bounds = array<i64: 1, 128>}, {pipeline_mode = #tpu.pipeline_mode<synchronous>, transform_indices = @transform_5, window_bounds = array<i64: 128, 128>}, {pipeline_mode = #tpu.pipeline_mode<synchronous>, transform_indices = @transform_6, window_bounds = array<i64: 1, 128>}, {transform_indices = @transform_7, window_bounds = array<i64: 1, 128, 128>}]} {
    %c0 = arith.constant 0 : index
    %c0_0 = arith.constant 0 : index
    %c0_1 = arith.constant 0 : index
    %0 = vector.load %arg3[%c0, %c0_0, %c0_1] : memref<1x128x32xbf16, #tpu.memory_space<vmem>>, vector<1x128x32xbf16>
    %1 = vector.shape_cast %0 : vector<1x128x32xbf16> to vector<128x32xbf16>
    %c0_2 = arith.constant 0 : index
    %c0_3 = arith.constant 0 : index
    %2 = vector.load %arg1[%c0_2, %c0_3] : memref<128x128xbf16, #tpu.memory_space<vmem>>, vector<128x128xbf16>
    %cst = arith.constant dense<0.000000e+00> : vector<128x32xf32>
    %3 = tpu.matmul %2, %1, %cst {dimension_numbers = #tpu.dot_dimension_numbers<[1], [0], [0], [1], [0, 0, 1, 1], [], []>} : vector<128x128xbf16>, vector<128x32xbf16>, vector<128x32xf32> -> vector<128x32xf32>
    %4 = arith.truncf %3 : vector<128x32xf32> to vector<128x32xbf16>
    %c0_4 = arith.constant 0 : index
    %c0_5 = arith.constant 0 : index
    %5 = vector.load %arg4[%c0_4, %c0_5] : memref<32x128xbf16, #tpu.memory_space<vmem>>, vector<32x128xbf16>
    %cst_6 = arith.constant dense<0.000000e+00> : vector<128x128xf32>
    %6 = tpu.matmul %4, %5, %cst_6 {dimension_numbers = #tpu.dot_dimension_numbers<[1], [0], [0], [1], [0, 0, 1, 1], [], []>} : vector<128x32xbf16>, vector<32x128xbf16>, vector<128x128xf32> -> vector<128x128xf32>
    %c0_7 = arith.constant 0 : index
    %c0_8 = arith.constant 0 : index
    %7 = vector.load %arg5[%c0_7, %c0_8] : memref<1x128xf32, #tpu.memory_space<vmem>>, vector<1x128xf32>
    %8 = vector.broadcast %7 : vector<1x128xf32> to vector<128x128xf32>
    %9 = arith.addf %6, %8 : vector<128x128xf32>
    %cst_9 = arith.constant 0.000000e+00 : f32
    %10 = vector.broadcast %cst_9 : f32 to vector<128x128xf32>
    %11 = arith.maximumf %9, %10 : vector<128x128xf32>
    %12 = arith.truncf %11 : vector<128x128xf32> to vector<128x128xbf16>
    %c0_10 = arith.constant 0 : index
    %c0_11 = arith.constant 0 : index
    %13 = vector.load %arg6[%c0_10, %c0_11] : memref<128x128xbf16, #tpu.memory_space<vmem>>, vector<128x128xbf16>
    %cst_12 = arith.constant dense<0.000000e+00> : vector<128x128xf32>
    %14 = tpu.matmul %12, %13, %cst_12 {dimension_numbers = #tpu.dot_dimension_numbers<[1], [0], [0], [1], [0, 0, 1, 1], [], []>} : vector<128x128xbf16>, vector<128x128xbf16>, vector<128x128xf32> -> vector<128x128xf32>
    %c0_13 = arith.constant 0 : index
    %c0_14 = arith.constant 0 : index
    %15 = vector.load %arg7[%c0_13, %c0_14] : memref<1x128xf32, #tpu.memory_space<vmem>>, vector<1x128xf32>
    %16 = vector.broadcast %15 : vector<1x128xf32> to vector<128x128xf32>
    %17 = arith.addf %14, %16 : vector<128x128xf32>
    %c0_15 = arith.constant 0 : index
    %c0_16 = arith.constant 0 : index
    %18 = vector.load %arg2[%c0_15, %c0_16] : memref<128x128xbf16, #tpu.memory_space<vmem>>, vector<128x128xbf16>
    %19 = arith.truncf %17 : vector<128x128xf32> to vector<128x128xbf16>
    %cst_17 = arith.constant dense<0.000000e+00> : vector<128x128xf32>
    %20 = tpu.matmul %18, %19, %cst_17 {dimension_numbers = #tpu.dot_dimension_numbers<[1], [0], [0], [1], [0, 0, 1, 1], [], []>} : vector<128x128xbf16>, vector<128x128xbf16>, vector<128x128xf32> -> vector<128x128xf32>
    %c0_18 = arith.constant 0 : index
    %c0_19 = arith.constant 0 : index
    %c0_20 = arith.constant 0 : index
    %21 = vector.load %arg8[%c0_18, %c0_19, %c0_20] : memref<1x128x128xf32, #tpu.memory_space<vmem>>, vector<1x128x128xf32>
    %22 = vector.shape_cast %21 : vector<1x128x128xf32> to vector<128x128xf32>
    %23 = vector.shape_cast %20 : vector<128x128xf32> to vector<1x128x128xf32>
    tpu.vector_store %arg8[%c0_18, %c0_19, %c0_20], %23 {strides = array<i32>} : memref<1x128x128xf32, #tpu.memory_space<vmem>>, vector<1x128x128xf32>,
    return
  }
  func.func @transform_0(%arg0: i32) -> (i32, i32) {
    %c0_i32 = arith.constant 0 : i32
    %c0_i32_0 = arith.constant 0 : i32
    %c0_i32_1 = arith.constant 0 : i32
    return %c0_i32, %c0_i32_0 : i32, i32
  }
  func.func @transform_1(%arg0: i32) -> (i32, i32) {
    %c0_i32 = arith.constant 0 : i32
    %c0_i32_0 = arith.constant 0 : i32
    %c0_i32_1 = arith.constant 0 : i32
    return %c0_i32, %c0_i32_0 : i32, i32
  }
  func.func @transform_2(%arg0: i32) -> (i32, i32, i32) {
    %c0_i32 = arith.constant 0 : i32
    %c0_i32_0 = arith.constant 0 : i32
    %c0_i32_1 = arith.constant 0 : i32
    return %arg0, %c0_i32, %c0_i32_0 : i32, i32, i32
  }
  func.func @transform_3(%arg0: i32) -> (i32, i32) {
    %c0_i32 = arith.constant 0 : i32
    %c0_i32_0 = arith.constant 0 : i32
    %c0_i32_1 = arith.constant 0 : i32
    return %c0_i32, %c0_i32_0 : i32, i32
  }
  func.func @transform_4(%arg0: i32) -> (i32, i32) {
    %c0_i32 = arith.constant 0 : i32
    %c0_i32_0 = arith.constant 0 : i32
    %c0_i32_1 = arith.constant 0 : i32
    return %c0_i32, %c0_i32_0 : i32, i32
  }
  func.func @transform_5(%arg0: i32) -> (i32, i32) {
    %c0_i32 = arith.constant 0 : i32
    %c0_i32_0 = arith.constant 0 : i32
    %c0_i32_1 = arith.constant 0 : i32
    return %c0_i32, %c0_i32_0 : i32, i32
  }
  func.func @transform_6(%arg0: i32) -> (i32, i32) {
    %c0_i32 = arith.constant 0 : i32
    %c0_i32_0 = arith.constant 0 : i32
    %c0_i32_1 = arith.constant 0 : i32
    return %c0_i32, %c0_i32_0 : i32, i32
  }
  func.func @transform_7(%arg0: i32) -> (i32, i32, i32) {
    %c0_i32 = arith.constant 0 : i32
    %c0_i32_0 = arith.constant 0 : i32
    %c0_i32_1 = arith.constant 0 : i32
    return %arg0, %c0_i32, %c0_i32_0 : i32, i32, i32
  }
}

</mosaic_0001>

<bundles_post_ra>
// kernel: tpu_custom_call.1
= control target key start
LH: loop header
LB: loop body
LE: loop exit
PB: predicated region body
PF: predicated region fallthrough
CT: control target
= control target key end

     0   :  { %12 = vsyncpa [#allocation3], 0  ;;  %s1845_s0 = inlined_call_operand.vmem [shape: bf16[128,128], index: 0, kind: input, shape index: {}]   ;;  %s1846_s1 = inlined_call_operand.vmem [shape: bf16[128,128], index: 1, kind: input, shape index: {}]   ;;  %s1847_s2 = inlined_call_operand.vmem [shape: bf16[2,128,32], index: 2, kind: input, shape index: {}]   ;;  %s1848_s3 = inlined_call_operand.vmem [shape: bf16[32,128], index: 3, kind: input, shape index: {}]   ;;  %s1849_s4 = inlined_call_operand.vmem [shape: f32[1,128], index: 4, kind: input, shape index: {}]   ;;  %s1850_s5 = inlined_call_operand.hbm [shape: bf16[128,128], index: 5, kind: input, shape index: {}]   ;;  %s1851_s6 = inlined_call_operand.vmem [shape: f32[1,128], index: 6, kind: input, shape index: {}]   ;;  %s1852_s7 = inlined_call_operand.hbm [shape: f32[2,128,128], index: 7, kind: output, shape index: {}]  }
   0x1   :  { %13 = vsyncpa [#allocation4], 0 }
   0x2   :  { %15 = vsyncpa [#allocation4 + $0x1], 0  ;;  %s1616_s24 = smov 0   ;;  %s1618_s25 = smov 0  }
   0x3   :  { %s1620_s26 = smov 0   ;;  %s1622_s27 = smov 0  }
   0x4 LB: > { %s1637_s28 = sadd.s32 4294967295, %s1568_s27   ;;  %s1136_s29 = sadd.s32 4294967294, %s1568_s27   ;;  %s1568_s27 = sphi %s1622_s27, %s1868_s27   ;;  %s1564_s26 = sphi %s1620_s26, %s1867_s26   ;;  %s1560_s25 = sphi %s1618_s25, %s1866_s25   ;;  %s1556_s24 = sphi %s1616_s24, %s1865_s24  }
   0x5   : > { %s1641_s30 = sadd.s32 1, %s1568_s27   ;;  %s180_s8 = sadd.s32 1, %s1564_s26 }
   0x6   : > { %s177_s9 = ssub.s32 %s1568_s27, %s1641_s30  ;;  %p190_p0 = scmp.ne.s32.totalorder %s1564_s26, %s1560_s25 }
   0x7   : > { %p178_p1 = scmp.eq.s32.totalorder %s177_s9, 0  ;;  %p191_p2 = scmp.eq.s32.totalorder %s1637_s28, 1 }
   0x8   : > { %p196_p3 = scmp.ne.s32.totalorder %s1560_s25, %s1556_s24  ;;  %p197_p4 = scmp.eq.s32.totalorder %s1136_s29, 1 }
   0x9   : > { %s1652_s10 = scalar_select %p178_p1, %s1564_s26, %s180_s8  }
   0xa   : > { %p1654_p5 = por %p191_p2, %p190_p0  ;;  %p1658_p6 = por %p197_p4, %p196_p3 }
   0xb   : > { %p1137_p7 = scmp.ge.s32.totalorder %s1568_s27, 1  ;;  %p204_p8 = scmp.lt.s32.totalorder %s1568_s27, 3 }
   0xc   : > { %s1856_s11 = scalar_select %p1654_p5, 1, 0 }
   0xd   : > { %s1857_s12 = scalar_select %p1658_p6, 1, 0 }
   0xe   : > { %p1853_p9 = scmp.eq.s32.totalorder %s1637_s28, 0  ;;  %p1665_p10 = pnand %p1137_p7, %p204_p8 }
   0xf   : > { %s1570_s14 = smov [#allocation2]   ;;  %s1474_s19 = scalar_lea.hbm %s1850_s5, 1024 }
  0x10   : > { %s1858_s13 = scalar_select %p1665_p10, 1, 0 }
  0x11   : > { %s228_s15 = sshll.u32 %s1570_s14, 4  ;;  %p1392_p11 = pneg %p1665_p10  ;;  %s229_s15 = int_to_ptr.vmem [resolvable:$true] %s228_s15 }
  0x12   : > { %p1475_p13 = scmp.ne.s32.totalorder %s1850_s5, %s1474_s19  ;;  %p1481_p3 = scmp.lt.u32.totalorder %s1474_s19, %s1850_s5 }
  0x13   : > { %p1673_p12 = pnand %p1853_p9, %p1392_p11 }
  0x15   : > { %p1476_p0 = pneg %p1673_p12 }
  0x17   : > { %p1477_p1 = pnand %p1476_p0, %p1475_p13 }
  0x19   : > { %p1478_p2 = pneg %p1477_p1 }
  0x1b   : > { %p1483_p4 = pnand %p1481_p3, %p1478_p2 }
  0x1d   : > { %1486 = shalt.err (!%p1483_p4)
}
  0x1e   : > { %s1487_s29 = scalar_lea.vmem %s229_s15, 1024  ;;  %p1495_p9 = scmp.lt.s32.totalorder %s229_s15, %s229_s15 }
  0x1f   : > { %p1488_p7 = scmp.ne.s32.totalorder %s229_s15, %s1487_s29  ;;  %p1496_p6 = scmp.lt.s32.totalorder %s1487_s29, %s1487_s29 }
  0x21   : > { %p1490_p8 = pnand %p1488_p7, %p1476_p0  ;;  %p1497_p5 = por %p1496_p6, %p1495_p9 }
  0x23   : > { %p1491_p11 = pneg %p1490_p8 }
  0x25   : > { %p1498_p10 = pnand %p1497_p5, %p1491_p11 }
  0x27   : > { %1501 = shalt.err (!%p1498_p10)
}
  0x28   : > { %s1571_s8 = smov 64   ;;  %s1572_s9 = smov 4  }
  0x29   : > { %1395 = dma.hbm_to_vmem [thread:$0]  (!%p1673_p12), %s1850_s5, 1024, %s229_s15, [#allocation3], %s1571_s8, %s1571_s8, %s1572_s9  }
  0x2a   : > { %p1860_p13 = scmp.ne.s32.totalorder %s1858_s13, 0 }
  0x2b   : > { %p1861_p1 = scmp.eq.s32.totalorder (!%p1860_p13), %s1637_s28, 0 }
  0x2c   : > { %255 = sbr.rel (%p1860_p13) target bundleno = 1028 (0x404), region = 48 }
  0x33   : > { %1547 = dma.done.wait (%p1861_p1), [#allocation3], 1024   ;;  %p1862_p0 = pmov %p1861_p1 }
  0x34   : > { %p287_p5 = scmp.lt.s32.totalorder %s1637_s28, 1  ;;  %v1448_v4 = vld [vmem:[%s1845_s0] sm:$0xff]   ;;  %v1449_v10 = vld [vmem:[%s1845_s0 + $0x8] sm:$0xff]   ;;  %v1450_v11 = vld [vmem:[%s1845_s0 + $0x10] sm:$0xff]   ;;  %vm549_vm0 = vcmask 261120   ;;  %s284_s16 = sand.u32 1, %s1560_s25  }
  0x35   : > { %1549 = vsyncadd (%p1862_p0), [#allocation3], 4294966272  ;;  %1270 = vmatprep.mubr.bf16.mxu0 %v1448_v4  ;;  %v1456_v7 = vld [vmem:[%s1848_s3] sm:$0xff]   ;;  %v1451_v12 = vld [vmem:[%s1845_s0 + $0x18] sm:$0xff]   ;;  %s1195_s15 = sshll.u32 %s1637_s28, 11  ;;  %p1863_p9 = scmp.ne.s32.totalorder %s1856_s11, 0 }
  0x36   : > { %s288_s18 = scalar_select %p287_p5, %s1637_s28, 1  ;;  %1286 = vmatprep.subr.bf16.mxu1 %v1456_v7  ;;  %v1452_v13 = vld [vmem:[%s1845_s0 + $0x20] sm:$0xff]   ;;  %v1453_v14 = vld [vmem:[%s1845_s0 + $0x28] sm:$0xff]   ;;  %v1454_v15 = vld [vmem:[%s1845_s0 + $0x30] sm:$0xff]  }
  0x37   : > { %1287 = vmatpush3.bf16.msra.mxu1 %v1456_v7  ;;  %v1455_v16 = vld [vmem:[%s1845_s0 + $0x38] sm:$0xff]   ;;  %v1457_v17 = vld [vmem:[%s1848_s3 + $0x8] sm:$0xff]   ;;  %v1458_v18 = vld [vmem:[#allocation2] sm:$0xff]   ;;  %s1795_s8 = scalar_lea.hbm %s1852_s7, %s1195_s15  ;;  %s1804_s28 = scalar_lea.sflag [#allocation4], %s284_s16 }
  0x38   : > { %s1194_s19 = sshll.u32 %s288_s18, 6  ;;  %1288 = vmatprep.subr.bf16.mxu1 %v1457_v17  ;;  %v1459_v25 = vld [vmem:[#allocation2 + $0x8] sm:$0xff]   ;;  %v1460_v28 = vld [vmem:[#allocation2 + $0x10] sm:$0xff]   ;;  %v1461_v33 = vld [vmem:[#allocation2 + $0x18] sm:$0xff]   ;;  %s1573_s14 = smov [#allocation5]  }
  0x39   : > { %s291_s21 = scalar_lea.vmem %s1847_s2, %s1194_s19  ;;  %v1462_v36 = vld [vmem:[#allocation2 + $0x20] sm:$0xff]   ;;  %v1463_v41 = vld [vmem:[#allocation2 + $0x28] sm:$0xff]   ;;  %v1464_v48 = vld [vmem:[#allocation2 + $0x30] sm:$0xff]   ;;  %s1506_s17 = sshll.u32 %s1573_s14, 4  ;;  %s1507_s17 = int_to_ptr.vmem [resolvable:$false] %s1506_s17 }
  0x3a   : > { %v1440_v0 = vld [vmem:[%s291_s21] sm:$0xff]   ;;  %v1441_v1 = vld [vmem:[%s291_s21 + $0x8] sm:$0xff]   ;;  %v1442_v2 = vld [vmem:[%s291_s21 + $0x10] sm:$0xff]   ;;  %s1508_s18 = scalar_lea.vmem %s1507_s17, 4096 }
  0x3b   : > { %1254 = vmatprep.subr.bf16.mxu0 %v1440_v0  ;;  %v1443_v3 = vld [vmem:[%s291_s21 + $0x18] sm:$0xff]   ;;  %v1444_v5 = vld [vmem:[%s291_s21 + $0x20] sm:$0xff]   ;;  %v1445_v6 = vld [vmem:[%s291_s21 + $0x28] sm:$0xff]   ;;  %1289 = vmatpush3.bf16.msra.mxu1 %v1457_v17 }
  0x3c   : > { %1255 = vmatpush3.bf16.msra.mxu0 %v1440_v0  ;;  %v1446_v8 = vld [vmem:[%s291_s21 + $0x30] sm:$0xff]   ;;  %v1447_v9 = vld [vmem:[%s291_s21 + $0x38] sm:$0xff]   ;;  %1306 = vmatprep.subr.bf16.mxu1 %v1458_v18  ;;  %v1161_v50 = vld [vmem:[%s1849_s4] ss:$0 sm:$0xff]  ;;  %s1142_s21 = sshll.u32 %s284_s16, 7 }
  0x3d   : > { %1256 = vmatprep.subr.bf16.mxu0 %v1441_v1  ;;  %v1465_v49 = vld [vmem:[#allocation2 + $0x38] sm:$0xff]   ;;  %s1775_s13 = scalar_lea.vmem [#allocation5], %s1142_s21 }
  0x3e   : > { %s1062_s22 = sshll.u32 %s1775_s13, 4  ;;  %s1797_s22 = int_to_ptr.vmem [resolvable:$true] %s1062_s22 }
  0x3f   : > { %s1502_s9 = scalar_lea.vmem %s1797_s22, 2048  ;;  %p1509_p2 = scmp.lt.s32.totalorder %s1797_s22, %s1507_s17 }
  0x40   : > { %1257 = vmatpush3.bf16.msra.mxu0 %v1441_v1  ;;  %p1503_p6 = scmp.ne.s32.totalorder %s1797_s22, %s1502_s9  ;;  %p1510_p3 = scmp.lt.s32.totalorder %s1508_s18, %s1502_s9 }
  0x41   : > { %1258 = vmatprep.subr.bf16.mxu0 %v1442_v2 }
  0x42   : > { %p1504_p10 = pnand %p1503_p6, %p1863_p9  ;;  %p1511_p4 = por %p1510_p3, %p1509_p2 }
  0x44   : > { %1259 = vmatpush3.bf16.msra.mxu0 %v1442_v2  ;;  %p1505_p12 = pneg %p1504_p10 }
  0x45   : > { %1260 = vmatprep.subr.bf16.mxu0 %v1443_v3 }
  0x46   : > { %p1512_p7 = pnand %p1511_p4, %p1505_p12 }
  0x48   : > { %1261 = vmatpush3.bf16.msra.mxu0 %v1443_v3 }
  0x49   : > { %1262 = vmatprep.subr.bf16.mxu0 %v1444_v5 }
  0x4c   : > { %1263 = vmatpush3.bf16.msra.mxu0 %v1444_v5 }
  0x4d   : > { %1264 = vmatprep.subr.bf16.mxu0 %v1445_v6 }
  0x50   : > { %1265 = vmatpush3.bf16.msra.mxu0 %v1445_v6 }
  0x51   : > { %1266 = vmatprep.subr.bf16.mxu0 %v1446_v8 }
  0x54   : > { %1267 = vmatpush3.bf16.msra.mxu0 %v1446_v8 }
  0x55   : > { %1268 = vmatprep.subr.bf16.mxu0 %v1447_v9 }
  0x58   : > { %1269 = vmatpush3.bf16.msra.mxu0 %v1447_v9 }
  0x5b   : > { %1271 = vmatmul.mubr.bf16.vlgmr.msra.gmra.mrb[0].mxu0 %v1449_v10 }
  0x5c   : > { %1274 = vmatprep.mubr.bf16.mxu0 %v1450_v11 }
  0x63   : > { %1275 = vmatmul.mubr.bf16.gmra.mrb[4].mxu0 %v1451_v12 }
  0x64   : > { %1278 = vmatprep.mubr.bf16.mxu0 %v1452_v13 }
  0x6b   : > { %1279 = vmatmul.mubr.bf16.gmra.mrb[8].mxu0 %v1453_v14 }
  0x6c   : > { %1282 = vmatprep.mubr.bf16.mxu0 %v1454_v15 }
  0x73   : > { %1283 = vmatmul.mubr.bf16.gmra.mrb[12].mxu0 %v1455_v16 }
 0x12e   : > { %v1272_v19 = vpop.f32.mrb[0].mxu0 }
 0x12f   : > { %v455_v20 = vpop.f32.mrb[1].mxu0 }
 0x130   : > { %v1273_v21 = vpop.f32.mrb[2].mxu0 }
 0x131   : > { %v519_v22 = vpack.c.bf16 %v1273_v21, %v1272_v19  ;;  %v458_v23 = vpop.f32.mrb[3].mxu0 }
 0x132   : > { %v518_v24 = vpack.c.bf16 %v458_v23, %v455_v20 }
 0x134   : > { %1290 = vmatprep.mubr.msk.bf16.mxu1 %vm549_vm0, %v518_v24 }
 0x135   : > { %1291 = vmatmul.mubr.msk.bf16.vlgmr.msra.gmra.mrb[0].mxu1 %vm549_vm0, %v519_v22 }
 0x136   : > { %v1276_v26 = vpop.f32.mrb[4].mxu0  ;;  %1307 = vmatpush3.bf16.msra.mxu1 %v1458_v18 }
 0x137   : > { %v471_v27 = vpop.f32.mrb[5].mxu0  ;;  %1308 = vmatprep.subr.bf16.mxu1 %v1459_v25 }
 0x138   : > { %v1277_v29 = vpop.f32.mrb[6].mxu0 }
 0x139   : > { %v521_v30 = vpack.c.bf16 %v1277_v29, %v1276_v26  ;;  %v474_v31 = vpop.f32.mrb[7].mxu0 }
 0x13a   : > { %v520_v32 = vpack.c.bf16 %v474_v31, %v471_v27  ;;  %1309 = vmatpush3.bf16.msra.mxu1 %v1459_v25 }
 0x13b   : > { %1310 = vmatprep.subr.bf16.mxu1 %v1460_v28 }
 0x13c   : > { %1294 = vmatprep.mubr.msk.bf16.mxu1 %vm549_vm0, %v520_v32 }
 0x13d   : > { %1295 = vmatmul.mubr.msk.bf16.gmra.mrb[4].mxu1 %vm549_vm0, %v521_v30 }
 0x13e   : > { %v1280_v34 = vpop.f32.mrb[8].mxu0  ;;  %1311 = vmatpush3.bf16.msra.mxu1 %v1460_v28 }
 0x13f   : > { %v487_v35 = vpop.f32.mrb[9].mxu0  ;;  %1312 = vmatprep.subr.bf16.mxu1 %v1461_v33 }
 0x140   : > { %v1281_v37 = vpop.f32.mrb[10].mxu0 }
 0x141   : > { %v523_v38 = vpack.c.bf16 %v1281_v37, %v1280_v34  ;;  %v490_v39 = vpop.f32.mrb[11].mxu0 }
 0x142   : > { %v522_v40 = vpack.c.bf16 %v490_v39, %v487_v35  ;;  %1313 = vmatpush3.bf16.msra.mxu1 %v1461_v33 }
 0x143   : > { %1314 = vmatprep.subr.bf16.mxu1 %v1462_v36 }
 0x144   : > { %1298 = vmatprep.mubr.msk.bf16.mxu1 %vm549_vm0, %v522_v40 }
 0x145   : > { %1299 = vmatmul.mubr.msk.bf16.gmra.mrb[8].mxu1 %vm549_vm0, %v523_v38 }
 0x146   : > { %v1284_v42 = vpop.f32.mrb[12].mxu0  ;;  %1315 = vmatpush3.bf16.msra.mxu1 %v1462_v36 }
 0x147   : > { %v503_v43 = vpop.f32.mrb[13].mxu0  ;;  %1316 = vmatprep.subr.bf16.mxu1 %v1463_v41 }
 0x148   : > { %v1285_v44 = vpop.f32.mrb[14].mxu0 }
 0x149   : > { %v525_v45 = vpack.c.bf16 %v1285_v44, %v1284_v42  ;;  %v506_v46 = vpop.f32.mrb[15].mxu0  ;;  %v1470_v44 = vld [vmem:[%s1846_s1 + $0x30] sm:$0xff]  }
 0x14a   : > { %v524_v47 = vpack.c.bf16 %v506_v46, %v503_v43  ;;  %1317 = vmatpush3.bf16.msra.mxu1 %v1463_v41  ;;  %v1466_v43 = vld [vmem:[%s1846_s1] sm:$0xff]  }
 0x14b   : > { %1318 = vmatprep.subr.bf16.mxu1 %v1464_v48  ;;  %1354 = vmatprep.mubr.bf16.mxu0 %v1466_v43  ;;  %v1172_v46 = vld [vmem:[%s1851_s6] ss:$0 sm:$0xff] }
 0x14c   : > { %1302 = vmatprep.mubr.msk.bf16.mxu1 %vm549_vm0, %v524_v47 }
 0x14d   : > { %1303 = vmatmul.mubr.msk.bf16.gmra.mrb[12].mxu1 %vm549_vm0, %v525_v45 }
 0x14e   : > { %1319 = vmatpush3.bf16.msra.mxu1 %v1464_v48 }
 0x14f   : > { %1320 = vmatprep.subr.bf16.mxu1 %v1465_v49 }
 0x152   : > { %1321 = vmatpush3.bf16.msra.mxu1 %v1465_v49 }
 0x208   : > { %v1292_v51 = vpop.f32.mrb[0].mxu1 }
 0x209   : > { %v617_v52 = vadd.f32 %v1292_v51, %v1161_v50  ;;  %v608_v53 = vpop.f32.mrb[1].mxu1 }
 0x20a   : > { %v609_v54 = vadd.f32 %v1161_v50, %v608_v53  ;;  %v1293_v55 = vpop.f32.mrb[2].mxu1 }
 0x20b   : > { %v620_v56 = vadd.f32 %v1293_v55, %v1161_v50  ;;  %v611_v57 = vpop.f32.mrb[3].mxu1  ;;  %v673_v59 = vmax.f32 %v617_v52, 0.0 }
 0x20c   : > { %v612_v58 = vadd.f32 %v1161_v50, %v611_v57  ;;  %v671_v61 = vmax.f32 %v609_v54, 0.0 }
 0x20d   : > { %v674_v60 = vmax.f32 %v620_v56, 0.0 }
 0x20e   : > { %v672_v62 = vmax.f32 %v612_v58, 0.0 }
 0x20f   : > { %v688_v63 = vpack.c.bf16 %v674_v60, %v673_v59 }
 0x210   : > { %v687_v0 = vpack.c.bf16 %v672_v62, %v671_v61  ;;  %v1296_v1 = vpop.f32.mrb[4].mxu1 }
 0x211   : > { %v633_v2 = vadd.f32 %v1296_v1, %v1161_v50  ;;  %v624_v3 = vpop.f32.mrb[5].mxu1 }
 0x212   : > { %v625_v4 = vadd.f32 %v1161_v50, %v624_v3  ;;  %v1297_v5 = vpop.f32.mrb[6].mxu1  ;;  %1322 = vmatprep.mubr.bf16.mxu1 %v687_v0 }
 0x213   : > { %v636_v6 = vadd.f32 %v1297_v5, %v1161_v50  ;;  %v627_v7 = vpop.f32.mrb[7].mxu1  ;;  %1323 = vmatmul.mubr.bf16.vlgmr.msra.gmra.mrb[16].mxu1 %v688_v63  ;;  %v677_v9 = vmax.f32 %v633_v2, 0.0 }
 0x214   : > { %v628_v8 = vadd.f32 %v1161_v50, %v627_v7  ;;  %v675_v11 = vmax.f32 %v625_v4, 0.0 }
 0x215   : > { %v678_v10 = vmax.f32 %v636_v6, 0.0 }
 0x216   : > { %v676_v12 = vmax.f32 %v628_v8, 0.0 }
 0x217   : > { %v690_v13 = vpack.c.bf16 %v678_v10, %v677_v9 }
 0x218   : > { %v689_v14 = vpack.c.bf16 %v676_v12, %v675_v11  ;;  %v1300_v15 = vpop.f32.mrb[8].mxu1 }
 0x219   : > { %v649_v16 = vadd.f32 %v1300_v15, %v1161_v50  ;;  %v640_v17 = vpop.f32.mrb[9].mxu1 }
 0x21a   : > { %v641_v18 = vadd.f32 %v1161_v50, %v640_v17  ;;  %v1301_v19 = vpop.f32.mrb[10].mxu1  ;;  %1326 = vmatprep.mubr.bf16.mxu1 %v689_v14 }
 0x21b   : > { %v652_v20 = vadd.f32 %v1301_v19, %v1161_v50  ;;  %v643_v21 = vpop.f32.mrb[11].mxu1  ;;  %1327 = vmatmul.mubr.bf16.gmra.mrb[20].mxu1 %v690_v13  ;;  %v681_v23 = vmax.f32 %v649_v16, 0.0 }
 0x21c   : > { %v644_v22 = vadd.f32 %v1161_v50, %v643_v21  ;;  %v679_v25 = vmax.f32 %v641_v18, 0.0 }
 0x21d   : > { %v682_v24 = vmax.f32 %v652_v20, 0.0 }
 0x21e   : > { %v680_v26 = vmax.f32 %v644_v22, 0.0  ;;  %v1467_v22 = vld [vmem:[%s1846_s1 + $0x8] sm:$0xff]  }
 0x21f   : > { %v692_v27 = vpack.c.bf16 %v682_v24, %v681_v23  ;;  %v1471_v23 = vld [vmem:[%s1846_s1 + $0x38] sm:$0xff]   ;;  %v1468_v24 = vld [vmem:[%s1846_s1 + $0x10] sm:$0xff]  }
 0x220   : > { %v691_v28 = vpack.c.bf16 %v680_v26, %v679_v25  ;;  %v1304_v29 = vpop.f32.mrb[12].mxu1  ;;  %v1469_v25 = vld [vmem:[%s1846_s1 + $0x18] sm:$0xff]   ;;  %v1472_v26 = vld [vmem:[%s1846_s1 + $0x20] sm:$0xff]  }
 0x221   : > { %v665_v30 = vadd.f32 %v1304_v29, %v1161_v50  ;;  %v656_v31 = vpop.f32.mrb[13].mxu1 }
 0x222   : > { %v657_v32 = vadd.f32 %v1161_v50, %v656_v31  ;;  %v1305_v33 = vpop.f32.mrb[14].mxu1  ;;  %1330 = vmatprep.mubr.bf16.mxu1 %v691_v28 }
 0x223   : > { %v668_v34 = vadd.f32 %v1305_v33, %v1161_v50  ;;  %v659_v35 = vpop.f32.mrb[15].mxu1  ;;  %1331 = vmatmul.mubr.bf16.gmra.mrb[24].mxu1 %v692_v27  ;;  %v685_v37 = vmax.f32 %v665_v30, 0.0  ;;  %v1473_v27 = vld [vmem:[%s1846_s1 + $0x28] sm:$0xff]  }
 0x224   : > { %v660_v36 = vadd.f32 %v1161_v50, %v659_v35  ;;  %v683_v39 = vmax.f32 %v657_v32, 0.0 }
 0x225   : > { %v686_v38 = vmax.f32 %v668_v34, 0.0 }
 0x226   : > { %v684_v40 = vmax.f32 %v660_v36, 0.0 }
 0x227   : > { %v694_v41 = vpack.c.bf16 %v686_v38, %v685_v37 }
 0x228   : > { %v693_v42 = vpack.c.bf16 %v684_v40, %v683_v39 }
 0x22a   : > { %1334 = vmatprep.mubr.bf16.mxu1 %v693_v42 }
 0x22b   : > { %1335 = vmatmul.mubr.bf16.gmra.mrb[28].mxu1 %v694_v41 }
 0x22c   : > { %1366 = vmatprep.mubr.bf16.mxu1 %v1470_v44 }
 0x2e6   : > { %v1324_v45 = vpop.f32.mrb[16].mxu1 }
 0x2e7   : > { %v800_v47 = vpop.f32.mrb[17].mxu1  ;;  %v809_v49 = vadd.f32 %v1324_v45, %v1172_v46 }
 0x2e8   : > { %v1325_v48 = vpop.f32.mrb[18].mxu1  ;;  %v801_v52 = vadd.f32 %v1172_v46, %v800_v47 }
 0x2e9   : > { %v812_v50 = vadd.f32 %v1325_v48, %v1172_v46  ;;  %v803_v51 = vpop.f32.mrb[19].mxu1 }
 0x2ea   : > { %v804_v53 = vadd.f32 %v1172_v46, %v803_v51 }
 0x2eb   : > { %v880_v54 = vpack.c.bf16 %v812_v50, %v809_v49 }
 0x2ec   : > { %v879_v55 = vpack.c.bf16 %v804_v53, %v801_v52 }
 0x2ee   : > { %v1328_v56 = vpop.f32.mrb[20].mxu1  ;;  %1338 = vmatprep.subr.bf16.mxu0 %v879_v55  ;;  %1370 = vmatprep.subr.bf16.mxu1 %v879_v55 }
 0x2ef   : > { %v816_v57 = vpop.f32.mrb[21].mxu1  ;;  %1339 = vmatpush3.bf16.msra.mxu0 %v879_v55  ;;  %1378 = vmatpush3.bf16.msra.mxu1 %v879_v55  ;;  %v825_v59 = vadd.f32 %v1328_v56, %v1172_v46 }
 0x2f0   : > { %v1329_v58 = vpop.f32.mrb[22].mxu1  ;;  %1340 = vmatprep.subr.bf16.mxu0 %v880_v54  ;;  %1371 = vmatprep.subr.bf16.mxu1 %v880_v54  ;;  %v817_v62 = vadd.f32 %v1172_v46, %v816_v57 }
 0x2f1   : > { %v828_v60 = vadd.f32 %v1329_v58, %v1172_v46  ;;  %v819_v61 = vpop.f32.mrb[23].mxu1 }
 0x2f2   : > { %v820_v63 = vadd.f32 %v1172_v46, %v819_v61 }
 0x2f3   : > { %v882_v0 = vpack.c.bf16 %v828_v60, %v825_v59  ;;  %1341 = vmatpush3.bf16.msra.mxu0 %v880_v54  ;;  %1379 = vmatpush3.bf16.msra.mxu1 %v880_v54 }
 0x2f4   : > { %v881_v1 = vpack.c.bf16 %v820_v63, %v817_v62 }
 0x2f6   : > { %v1332_v2 = vpop.f32.mrb[24].mxu1  ;;  %1342 = vmatprep.subr.bf16.mxu0 %v881_v1  ;;  %1372 = vmatprep.subr.bf16.mxu1 %v881_v1 }
 0x2f7   : > { %v832_v3 = vpop.f32.mrb[25].mxu1  ;;  %1343 = vmatpush3.bf16.msra.mxu0 %v881_v1  ;;  %1380 = vmatpush3.bf16.msra.mxu1 %v881_v1  ;;  %v841_v5 = vadd.f32 %v1332_v2, %v1172_v46 }
 0x2f8   : > { %v1333_v4 = vpop.f32.mrb[26].mxu1  ;;  %1344 = vmatprep.subr.bf16.mxu0 %v882_v0  ;;  %1373 = vmatprep.subr.bf16.mxu1 %v882_v0  ;;  %v833_v8 = vadd.f32 %v1172_v46, %v832_v3 }
 0x2f9   : > { %v844_v6 = vadd.f32 %v1333_v4, %v1172_v46  ;;  %v835_v7 = vpop.f32.mrb[27].mxu1 }
 0x2fa   : > { %v836_v9 = vadd.f32 %v1172_v46, %v835_v7 }
 0x2fb   : > { %v884_v10 = vpack.c.bf16 %v844_v6, %v841_v5  ;;  %1345 = vmatpush3.bf16.msra.mxu0 %v882_v0  ;;  %1381 = vmatpush3.bf16.msra.mxu1 %v882_v0 }
 0x2fc   : > { %v883_v11 = vpack.c.bf16 %v836_v9, %v833_v8 }
 0x2fe   : > { %v1336_v12 = vpop.f32.mrb[28].mxu1  ;;  %1346 = vmatprep.subr.bf16.mxu0 %v883_v11  ;;  %1374 = vmatprep.subr.bf16.mxu1 %v883_v11 }
 0x2ff   : > { %v848_v13 = vpop.f32.mrb[29].mxu1  ;;  %1347 = vmatpush3.bf16.msra.mxu0 %v883_v11  ;;  %1382 = vmatpush3.bf16.msra.mxu1 %v883_v11  ;;  %v857_v15 = vadd.f32 %v1336_v12, %v1172_v46 }
 0x300   : > { %v1337_v14 = vpop.f32.mrb[30].mxu1  ;;  %1348 = vmatprep.subr.bf16.mxu0 %v884_v10  ;;  %1375 = vmatprep.subr.bf16.mxu1 %v884_v10  ;;  %v849_v18 = vadd.f32 %v1172_v46, %v848_v13 }
 0x301   : > { %v860_v16 = vadd.f32 %v1337_v14, %v1172_v46  ;;  %v851_v17 = vpop.f32.mrb[31].mxu1 }
 0x302   : > { %v852_v19 = vadd.f32 %v1172_v46, %v851_v17 }
 0x303   : > { %v886_v20 = vpack.c.bf16 %v860_v16, %v857_v15  ;;  %1349 = vmatpush3.bf16.msra.mxu0 %v884_v10  ;;  %1383 = vmatpush3.bf16.msra.mxu1 %v884_v10 }
 0x304   : > { %v885_v21 = vpack.c.bf16 %v852_v19, %v849_v18 }
 0x306   : > { %1350 = vmatprep.subr.bf16.mxu0 %v885_v21  ;;  %1376 = vmatprep.subr.bf16.mxu1 %v885_v21 }
 0x307   : > { %1351 = vmatpush3.bf16.msra.mxu0 %v885_v21  ;;  %1384 = vmatpush3.bf16.msra.mxu1 %v885_v21 }
 0x308   : > { %1352 = vmatprep.subr.bf16.mxu0 %v886_v20  ;;  %1377 = vmatprep.subr.bf16.mxu1 %v886_v20 }
 0x30b   : > { %1353 = vmatpush3.bf16.msra.mxu0 %v886_v20  ;;  %1385 = vmatpush3.bf16.msra.mxu1 %v886_v20 }
 0x30e   : > { %1355 = vmatmul.mubr.bf16.vlgmr.msra.gmra.mrb[16].mxu0 %v1467_v22  ;;  %1367 = vmatmul.mubr.bf16.vlgmr.msra.gmra.mrb[32].mxu1 %v1471_v23 }
 0x30f   : > { %1358 = vmatprep.mubr.bf16.mxu0 %v1468_v24 }
 0x316   : > { %1359 = vmatmul.mubr.bf16.gmra.mrb[20].mxu0 %v1469_v25 }
 0x317   : > { %1362 = vmatprep.mubr.bf16.mxu0 %v1472_v26 }
 0x31e   : > { %1363 = vmatmul.mubr.bf16.gmra.mrb[24].mxu0 %v1473_v27 }
 0x3e1   : > { %v1356_v28 = vpop.f32.mrb[16].mxu0  ;;  %v1368_v29 = vpop.f32.mrb[32].mxu1 }
 0x3e2   : > { %1034 = vst [vmem:[%s1775_s13 + $0x10] sm:$0xff] %v1356_v28  ;;  %v969_v30 = vpop.f32.mrb[17].mxu0  ;;  %1046 = vst [vmem:[%s1775_s13 + $0x70] sm:$0xff] %v1368_v29  ;;  %v1017_v31 = vpop.f32.mrb[33].mxu1 }
 0x3e3   : > { %1032 = vst [vmem:[%s1775_s13] sm:$0xff] %v969_v30  ;;  %v1357_v32 = vpop.f32.mrb[18].mxu0  ;;  %1044 = vst [vmem:[%s1775_s13 + $0x60] sm:$0xff] %v1017_v31  ;;  %v1369_v33 = vpop.f32.mrb[34].mxu1 }
 0x3e4   : > { %1035 = vst [vmem:[%s1775_s13 + $0x18] sm:$0xff] %v1357_v32  ;;  %v972_v34 = vpop.f32.mrb[19].mxu0  ;;  %1047 = vst [vmem:[%s1775_s13 + $0x78] sm:$0xff] %v1369_v33  ;;  %v1020_v35 = vpop.f32.mrb[35].mxu1 }
 0x3e5   : > { %1033 = vst [vmem:[%s1775_s13 + $0x8] sm:$0xff] %v972_v34  ;;  %1045 = vst [vmem:[%s1775_s13 + $0x68] sm:$0xff] %v1020_v35 }
 0x3e9   : > { %v1360_v36 = vpop.f32.mrb[20].mxu0 }
 0x3ea   : > { %1038 = vst [vmem:[%s1775_s13 + $0x30] sm:$0xff] %v1360_v36  ;;  %v985_v37 = vpop.f32.mrb[21].mxu0 }
 0x3eb   : > { %1036 = vst [vmem:[%s1775_s13 + $0x20] sm:$0xff] %v985_v37  ;;  %v1361_v38 = vpop.f32.mrb[22].mxu0 }
 0x3ec   : > { %1039 = vst [vmem:[%s1775_s13 + $0x38] sm:$0xff] %v1361_v38  ;;  %v988_v39 = vpop.f32.mrb[23].mxu0 }
 0x3ed   : > { %1037 = vst [vmem:[%s1775_s13 + $0x28] sm:$0xff] %v988_v39 }
 0x3f1   : > { %v1364_v40 = vpop.f32.mrb[24].mxu0 }
 0x3f2   : > { %1042 = vst [vmem:[%s1775_s13 + $0x50] sm:$0xff] %v1364_v40  ;;  %v1001_v41 = vpop.f32.mrb[25].mxu0 }
 0x3f3   : > { %1040 = vst [vmem:[%s1775_s13 + $0x40] sm:$0xff] %v1001_v41  ;;  %v1365_v42 = vpop.f32.mrb[26].mxu0 }
 0x3f4   : > { %1043 = vst [vmem:[%s1775_s13 + $0x58] sm:$0xff] %v1365_v42  ;;  %v1004_v43 = vpop.f32.mrb[27].mxu0 }
 0x3f5   : > { %1041 = vst [vmem:[%s1775_s13 + $0x48] sm:$0xff] %v1004_v43 }
 0x3f6   : > { %1515 = shalt.err (!%p1512_p7)
}
 0x3f7   : > { %s1516_s19 = scalar_lea.hbm %s1795_s8, 2048  ;;  %s1520_s21 = scalar_lea.hbm %s1852_s7, 4096 }
 0x3f8   : > { %p1517_p8 = scmp.ne.s32.totalorder %s1795_s8, %s1516_s19  ;;  %p1521_p1 = scmp.lt.u32.totalorder %s1795_s8, %s1852_s7 }
 0x3f9   : > { %p1522_p0 = scmp.lt.u32.totalorder %s1520_s21, %s1516_s19  ;;  %p1524_p6 = scmp.lt.u32.totalorder %s1516_s19, %s1795_s8 }
 0x3fa   : > { %p1518_p11 = pnand %p1517_p8, %p1863_p9 }
 0x3fb   : > { %p1523_p5 = por %p1522_p0, %p1521_p1 }
 0x3fc   : > { %p1519_p13 = pneg %p1518_p11 }
 0x3fd   : > { %p1525_p10 = por %p1524_p6, %p1523_p5 }
 0x3ff   : > { %p1526_p12 = pnand %p1525_p10, %p1519_p13 }
 0x401   : > { %1529 = shalt.err (!%p1526_p12)
}
 0x402   : > { %s1574_s23 = smov 128   ;;  %s1575_s29 = smov 8  }
 0x403   : > { %1390 = dma.vmem_to_hbm [thread:$0]  (%p1863_p9), %s1797_s22, 2048, %s1795_s8, %s1804_s28, %s1574_s23, %s1574_s23, %s1575_s29  }
 0x404 PF: > { %p1402_p2 = scmp.ge.s32.totalorder %s1568_s27, 2  ;;  %s1077_s9 = sand.u32 1, %s1556_s24  }
 0x405   : > { %p1864_p3 = scmp.ne.s32.totalorder %s1857_s12, 0  ;;  %s1078_s14 = scalar_lea.sflag [#allocation4], %s1077_s9 }
 0x407   : > { %p1397_p4 = pnand %p1402_p2, %p1864_p3 }
 0x409   : > { %1551 = dma.done.wait (!%p1397_p4), %s1078_s14, 2048  }
 0x40a   : > { %1553 = vsyncadd (!%p1397_p4), %s1078_s14, 4294965248  ;;  %p18_p7 = scmp.ge.s32.totalorder %s1641_s30, 4   ;;  %s1865_s24 = smov %s1560_s25 }
 0x40b   : > { %s1866_s25 = smov %s1564_s26  ;;  %s1867_s26 = smov %s1652_s10 }
 0x40c   : > { %s1868_s27 = smov %s1641_s30  ;;  %20 = sbr.rel (!%p18_p7) target bundleno = 4 (0x4), region = 88 }
 0x413   :  { %1083 = vsyncpa [#allocation3], 1 }
 0x414   :  { %1085 = vsyncpa [#allocation3 + $0x1], 1 }
 0x415   :  { %1086 = vsyncpa [#allocation4], 1 }
 0x416   :  { %1088 = vsyncpa [#allocation4 + $0x1], 1 }

</bundles_post_ra>
